<compile_context>
chip_gen: v5e
topology: v5e:2x2
jax: 0.10.0
libtpu: 0.0.40
codegen_flags: <defaults>
</compile_context>

<pallas_src>
import functools

import jax
import jax.numpy as jnp
from jax.experimental import pallas as pl
from jax.experimental.pallas import tpu as pltpu

IN_DIM = 56          # fixed by nn.Linear(56, hidden)
IN_PAD = 64          # W1 row block padded 56 -> 64 (bf16 16-row tile alignment)
HIDDEN = 32          # FLAGS.hidden_size
N_FLAGS = 8          # len(FLAGS.flags)
LANES = 128
BATCH = 8

DEFAULT_TILE_B = 512  # multiple of 256 (v6e MXU) and 128 (v5e MXU)

# ---- packed-slab row layout (all offsets are multiples of 16 -> bf16 aligned)
_R_W1 = 0                       # (64, 128)  rows 0..55 / cols 0..31 real
_R_W2 = _R_W1 + IN_PAD          # (128,128)  rows/cols 0..31 real
_R_W3 = _R_W2 + LANES
_R_W4V = _R_W3 + LANES          # cols 0..31 = W4, col 32 = Wv (value head fused)
_R_WK = _R_W4V + LANES          # rows 0..31 / cols 0..7 real
_R_EMB = _R_WK + LANES          # rows 0..7 / cols 0..31 real (pass_emb)
_R_WH = _R_EMB + LANES          # rows 0..31 / cols 0..7 real
_R_BIAS = _R_WH + LANES         # 16 rows: b1, b2, b3, [b4|bv], bk, bh, 0...
SLAB_ROWS = _R_BIAS + 16        # 848
VALUE_COL = HIDDEN              # column 32 of the fused affine4 result / output

_NEG = -1e30                    # softmax mask value for padded lanes


def _make_kernel(tile_rows, num_sub):
    assert tile_rows % num_sub == 0
    sub_rows = tile_rows // num_sub
    assert sub_rows % 8 == 0 or num_sub == 1

    def kernel(x_ref, w_ref, out_ref):
        f32, bf16 = jnp.float32, jnp.bfloat16
        dot = functools.partial(jnp.dot, preferred_element_type=f32)

        # Static, tile-aligned slices of the bf16 parameter slab (loaded once
        # per grid step; the slab block index is constant across the grid so
        # its HBM->VMEM DMA happens only once).
        w1 = w_ref[_R_W1:_R_W1 + IN_PAD, :]
        w2 = w_ref[_R_W2:_R_W2 + LANES, :]
        w3 = w_ref[_R_W3:_R_W3 + LANES, :]
        w4v = w_ref[_R_W4V:_R_W4V + LANES, :]
        wk = w_ref[_R_WK:_R_WK + LANES, :]
        emb = w_ref[_R_EMB:_R_EMB + LANES, :]
        wh = w_ref[_R_WH:_R_WH + LANES, :]
        bias = w_ref[_R_BIAS:_R_BIAS + 16, :].astype(f32)      # one (16,128) tile
        b1, b2, b3 = bias[0:1, :], bias[1:2, :], bias[2:3, :]
        b4v, bk, bh = bias[3:4, :], bias[4:5, :], bias[5:6, :]

        lane = jax.lax.broadcasted_iota(jnp.int32, (sub_rows, LANES), 1)
        flag_mask = lane < N_FLAGS
        value_mask = lane == VALUE_COL

        # Two independent batch sub-tiles traced into the same basic block so
        # the scheduler can interleave their serial 7-dot chains on the MXU.
        for s in range(num_sub):
            r0 = s * sub_rows
            x = x_ref[r0:r0 + sub_rows, :]

            # activations stay 128 lanes wide; padded lanes are exactly zero
            # because the padded weight columns / bias lanes are zero.
            h = jnp.maximum(dot(x.astype(bf16), w1) + b1, 0.0)
            h = h + jnp.maximum(dot(h.astype(bf16), w2) + b2, 0.0)
            h = h + jnp.maximum(dot(h.astype(bf16), w3) + b3, 0.0)

            # fused affine4 + value head: cols 0..31 = affine4(h), col 32 = value
            z4 = dot(h.astype(bf16), w4v) + b4v
            query = h + jnp.maximum(z4, 0.0)   # lane-32 garbage harmless: wk row 32 == 0

            # intermediate softmax(action_key(query)) — approx reciprocal (EUP slot)
            zk = dot(query.astype(bf16), wk) + bk
            zk = jnp.where(flag_mask, zk, _NEG)
            zk = zk - jnp.max(zk, axis=-1, keepdims=True)
            ek = jnp.exp(zk)
            qk = ek * pl.reciprocal(jnp.sum(ek, axis=-1, keepdims=True), approx=True)

            wv_ = dot(qk.astype(bf16), emb)    # qk @ pass_emb

            # externally visible softmax(action_head(.)) — exact divide so the
            # action distribution is exactly normalized.
            zh = dot(wv_.astype(bf16), wh) + bh
            zh = jnp.where(flag_mask, zh, _NEG)
            zh = zh - jnp.max(zh, axis=-1, keepdims=True)
            eh = jnp.exp(zh)
            probs = eh / jnp.sum(eh, axis=-1, keepdims=True)

            # lane-dense output: cols 0..7 action probs, col 32 state value
            out_ref[r0:r0 + sub_rows, :] = jnp.where(value_mask, z4, probs)

    return kernel


def pack_params(params):
    """Pack all 15 parameter tensors into one (848, 128) lane-padded bf16 slab."""
    (w1, b1, w2, b2, w3, b3, w4, b4, wk, bk, wh, bh, wv, bv, emb) = params

    def padw(w, rows):
        r, c = w.shape
        return jnp.pad(w, ((0, rows - r), (0, LANES - c)))

    w4v = jnp.concatenate([w4, wv], axis=1)          # (32, 33): [W4 | Wv]

    bias = jnp.zeros((16, LANES), jnp.float32)
    bias = bias.at[0, :HIDDEN].set(b1[0])
    bias = bias.at[1, :HIDDEN].set(b2[0])
    bias = bias.at[2, :HIDDEN].set(b3[0])
    bias = bias.at[3, :HIDDEN].set(b4[0])
    bias = bias.at[3, VALUE_COL].set(bv[0, 0])
    bias = bias.at[4, :N_FLAGS].set(bk[0])
    bias = bias.at[5, :N_FLAGS].set(bh[0])

    slab = jnp.concatenate([
        padw(w1, IN_PAD),
        padw(w2, LANES),
        padw(w3, LANES),
        padw(w4v, LANES),
        padw(wk, LANES),
        padw(emb, LANES),
        padw(wh, LANES),
        bias,
    ], axis=0).astype(jnp.bfloat16)
    assert slab.shape == (SLAB_ROWS, LANES)
    # Invariant: padded rows (>= HIDDEN) of the action_key block must be zero so
    # the fused value living in `query` lane 32 cannot leak into the key logits.
    pad_rows = slab[_R_WK + HIDDEN:_R_WK + LANES, :].astype(jnp.float32)
    assert float(jnp.max(jnp.abs(pad_rows))) == 0.0
    return slab


def _round_up(n, m):
    return ((n + m - 1) // m) * m


@jax.jit
def policy_forward(x, slab):
    batch = x.shape[0]
    tile_b = min(DEFAULT_TILE_B, _round_up(batch, 8))
    padded = _round_up(batch, tile_b)
    num_sub = 2 if (tile_b >= 256 and tile_b % 16 == 0) else 1

    # pad rows to a tile multiple and the feature dim 56 -> 64 (zero columns
    # multiply zero-padded W1 rows, so the result is unchanged).
    x_p = jnp.pad(x.astype(jnp.float32),
                  ((0, padded - batch), (0, IN_PAD - IN_DIM)))

    out = pl.pallas_call(
        _make_kernel(tile_b, num_sub),
        out_shape=jax.ShapeDtypeStruct((padded, LANES), jnp.float32),
        grid=(padded // tile_b,),
        in_specs=[
            pl.BlockSpec((tile_b, IN_PAD), lambda i: (i, 0)),      # x tile
            pl.BlockSpec((SLAB_ROWS, LANES), lambda i: (0, 0)),    # resident weights
        ],
        out_specs=pl.BlockSpec((tile_b, LANES), lambda i: (i, 0)),
        compiler_params=pltpu.CompilerParams(
            dimension_semantics=("parallel",)),                    # megacore on v7x
    )(x_p, slab)

    action_prob = out[:batch, :N_FLAGS]
    state_values = out[:batch, VALUE_COL:VALUE_COL + 1]
    return action_prob, state_values


def init_params(key):
    """Deterministic synthetic parameter init (Xavier-ish uniform)."""
    def linear(key, fan_in, fan_out):
        k_w, k_b = jax.random.split(key)
        limit = (6.0 / (fan_in + fan_out)) ** 0.5
        w = jax.random.uniform(k_w, (fan_in, fan_out), jnp.float32, -limit, limit)
        b = jax.random.uniform(k_b, (1, fan_out), jnp.float32, -limit, limit)
        return w, b

    keys = jax.random.split(key, 8)
    w1, b1 = linear(keys[0], IN_DIM, HIDDEN)
    w2, b2 = linear(keys[1], HIDDEN, HIDDEN)
    w3, b3 = linear(keys[2], HIDDEN, HIDDEN)
    w4, b4 = linear(keys[3], HIDDEN, HIDDEN)
    wk, bk = linear(keys[4], HIDDEN, N_FLAGS)
    wh, bh = linear(keys[5], HIDDEN, N_FLAGS)
    wv, bv = linear(keys[6], HIDDEN, 1)
    limit = (6.0 / (N_FLAGS + HIDDEN)) ** 0.5
    emb = jax.random.uniform(keys[7], (N_FLAGS, HIDDEN), jnp.float32, -limit, limit)
    return (w1, b1, w2, b2, w3, b3, w4, b4, wk, bk, wh, bh, wv, bv, emb)


def _reference(x, params):
    """Pure-JAX f32 reference (the original module semantics)."""
    (w1, b1, w2, b2, w3, b3, w4, b4, wk, bk, wh, bh, wv, bv, emb) = params
    relu = lambda v: jnp.maximum(v, 0.0)
    h = relu(x @ w1 + b1)
    h = h + relu(h @ w2 + b2)
    h = h + relu(h @ w3 + b3)
    q = h + relu(h @ w4 + b4)
    qk = jax.nn.softmax(q @ wk + bk, axis=-1)
    wv_ = qk @ emb
    action = jax.nn.softmax(wv_ @ wh + bh, axis=-1)
    value = h @ wv + bv
    return action, value


def _reference_bf16(x, params):
    """Same math with bf16 weights / dot inputs + f32 accumulation — mirrors the
    kernel's numerics (up to the approx reciprocal in the intermediate softmax)."""
    bf16 = jnp.bfloat16
    (w1, b1, w2, b2, w3, b3, w4, b4, wk, bk, wh, bh, wv, bv, emb) = [
        p.astype(bf16).astype(jnp.float32) for p in params]
    mm = lambda a, w: jnp.dot(a.astype(bf16), w.astype(bf16),
                              preferred_element_type=jnp.float32)
    relu = lambda v: jnp.maximum(v, 0.0)
    h = relu(mm(x, w1) + b1)
    h = h + relu(mm(h, w2) + b2)
    h = h + relu(mm(h, w3) + b3)
    q = h + relu(mm(h, w4) + b4)
    qk = jax.nn.softmax(mm(q, wk) + bk, axis=-1)
    wv_ = mm(qk, emb)
    action = jax.nn.softmax(mm(wv_, wh) + bh, axis=-1)
    value = mm(h, wv) + bv
    return action, value


if __name__ == "__main__":
    key = jax.random.PRNGKey(0)
    k_x, k_p, k_x2 = jax.random.split(key, 3)
    params = init_params(k_p)
    slab = pack_params(params)           # packed once, reused across calls

    # --- small RL-style batch -------------------------------------------------
    x = jax.random.normal(k_x, (BATCH, IN_DIM), jnp.float32)
    action_prob, state_values = policy_forward(x, slab)
    jax.block_until_ready((action_prob, state_values))

    assert action_prob.shape == (BATCH, N_FLAGS)
    assert state_values.shape == (BATCH, 1)

    ref_a32, ref_v32 = _reference(x, params)
    ref_abf, ref_vbf = _reference_bf16(x, params)

    # exact normalization of the visible action distribution (exact divide)
    assert jnp.allclose(jnp.sum(action_prob, axis=-1), 1.0, atol=1e-5)
    # tight match against the numerics-matched bf16 reference
    assert jnp.allclose(state_values, ref_vbf, atol=1e-3)
    assert jnp.allclose(action_prob, ref_abf, atol=1.5e-2)
    # module (f32) semantics preserved within bf16 rounding tolerance
    assert jnp.allclose(action_prob, ref_a32, atol=3e-2)
    assert jnp.allclose(state_values, ref_v32, atol=5e-2, rtol=5e-2)

    # --- throughput-shaped batch: exercises grid > 1, padding, sub-tiles ------
    xl = jax.random.normal(k_x2, (600, IN_DIM), jnp.float32)
    a_l, v_l = policy_forward(xl, slab)
    jax.block_until_ready((a_l, v_l))
    assert a_l.shape == (600, N_FLAGS) and v_l.shape == (600, 1)
    assert jnp.allclose(jnp.sum(a_l, axis=-1), 1.0, atol=1e-5)
    assert bool(jnp.all(jnp.isfinite(a_l))) and bool(jnp.all(jnp.isfinite(v_l)))

    print("KERNEL_OK")
</pallas_src>

<mosaic_0001>
module attributes {stable_mosaic.version = 11 : i64} {
  func.func @kernel(%arg0: i32, %arg1: memref<8x64xf32, #tpu.memory_space<vmem>>, %arg2: memref<848x128xbf16, #tpu.memory_space<vmem>>, %arg3: memref<8x128xf32, #tpu.memory_space<vmem>>) attributes {dimension_semantics = [#tpu.dimension_semantics<parallel>], iteration_bounds = array<i64: 1>, scalar_prefetch = 0 : i64, scratch_operands = 0 : i64, tpu.core_type = #tpu.core_type<tc>, window_params = [{transform_indices = @transform_0, window_bounds = array<i64: 8, 64>}, {pipeline_mode = #tpu.pipeline_mode<synchronous>, transform_indices = @transform_1, window_bounds = array<i64: 848, 128>}, {transform_indices = @transform_2, window_bounds = array<i64: 8, 128>}]} {
    %c0 = arith.constant 0 : index
    %c0_0 = arith.constant 0 : index
    %0 = vector.load %arg2[%c0, %c0_0] : memref<848x128xbf16, #tpu.memory_space<vmem>>, vector<64x128xbf16>
    %c64 = arith.constant 64 : index
    %c0_1 = arith.constant 0 : index
    %1 = vector.load %arg2[%c64, %c0_1] : memref<848x128xbf16, #tpu.memory_space<vmem>>, vector<128x128xbf16>
    %c192 = arith.constant 192 : index
    %c0_2 = arith.constant 0 : index
    %2 = vector.load %arg2[%c192, %c0_2] : memref<848x128xbf16, #tpu.memory_space<vmem>>, vector<128x128xbf16>
    %c320 = arith.constant 320 : index
    %c0_3 = arith.constant 0 : index
    %3 = vector.load %arg2[%c320, %c0_3] : memref<848x128xbf16, #tpu.memory_space<vmem>>, vector<128x128xbf16>
    %c448 = arith.constant 448 : index
    %c0_4 = arith.constant 0 : index
    %4 = vector.load %arg2[%c448, %c0_4] : memref<848x128xbf16, #tpu.memory_space<vmem>>, vector<128x128xbf16>
    %c576 = arith.constant 576 : index
    %c0_5 = arith.constant 0 : index
    %5 = vector.load %arg2[%c576, %c0_5] : memref<848x128xbf16, #tpu.memory_space<vmem>>, vector<128x128xbf16>
    %c704 = arith.constant 704 : index
    %c0_6 = arith.constant 0 : index
    %6 = vector.load %arg2[%c704, %c0_6] : memref<848x128xbf16, #tpu.memory_space<vmem>>, vector<128x128xbf16>
    %c832 = arith.constant 832 : index
    %c0_7 = arith.constant 0 : index
    %7 = vector.load %arg2[%c832, %c0_7] : memref<848x128xbf16, #tpu.memory_space<vmem>>, vector<16x128xbf16>
    %8 = arith.extf %7 : vector<16x128xbf16> to vector<16x128xf32>
    %9 = vector.extract_strided_slice %8 {offsets = [0, 0], sizes = [1, 128], strides = [1, 1]} : vector<16x128xf32> to vector<1x128xf32>
    %10 = vector.extract_strided_slice %8 {offsets = [1, 0], sizes = [1, 128], strides = [1, 1]} : vector<16x128xf32> to vector<1x128xf32>
    %11 = vector.extract_strided_slice %8 {offsets = [2, 0], sizes = [1, 128], strides = [1, 1]} : vector<16x128xf32> to vector<1x128xf32>
    %12 = vector.extract_strided_slice %8 {offsets = [3, 0], sizes = [1, 128], strides = [1, 1]} : vector<16x128xf32> to vector<1x128xf32>
    %13 = vector.extract_strided_slice %8 {offsets = [4, 0], sizes = [1, 128], strides = [1, 1]} : vector<16x128xf32> to vector<1x128xf32>
    %14 = vector.extract_strided_slice %8 {offsets = [5, 0], sizes = [1, 128], strides = [1, 1]} : vector<16x128xf32> to vector<1x128xf32>
    %15 = tpu.iota {dimensions = array<i32: 1>} : vector<8x128xi32>
    %c8_i32 = arith.constant 8 : i32
    %16 = vector.broadcast %c8_i32 : i32 to vector<8x128xi32>
    %17 = arith.cmpi slt, %15, %16 : vector<8x128xi32>
    %c32_i32 = arith.constant 32 : i32
    %18 = vector.broadcast %c32_i32 : i32 to vector<8x128xi32>
    %19 = arith.cmpi eq, %15, %18 : vector<8x128xi32>
    %c0_8 = arith.constant 0 : index
    %c0_9 = arith.constant 0 : index
    %20 = vector.load %arg1[%c0_8, %c0_9] : memref<8x64xf32, #tpu.memory_space<vmem>>, vector<8x64xf32>
    %21 = arith.truncf %20 : vector<8x64xf32> to vector<8x64xbf16>
    %cst = arith.constant dense<0.000000e+00> : vector<8x128xf32>
    %22 = tpu.matmul %21, %0, %cst {dimension_numbers = #tpu.dot_dimension_numbers<[1], [0], [0], [1], [0, 0, 1, 1], [], []>} : vector<8x64xbf16>, vector<64x128xbf16>, vector<8x128xf32> -> vector<8x128xf32>
    %23 = vector.broadcast %9 : vector<1x128xf32> to vector<8x128xf32>
    %24 = arith.addf %22, %23 : vector<8x128xf32>
    %cst_10 = arith.constant 0.000000e+00 : f32
    %25 = vector.broadcast %cst_10 : f32 to vector<8x128xf32>
    %26 = arith.maximumf %24, %25 : vector<8x128xf32>
    %27 = arith.truncf %26 : vector<8x128xf32> to vector<8x128xbf16>
    %cst_11 = arith.constant dense<0.000000e+00> : vector<8x128xf32>
    %28 = tpu.matmul %27, %1, %cst_11 {dimension_numbers = #tpu.dot_dimension_numbers<[1], [0], [0], [1], [0, 0, 1, 1], [], []>} : vector<8x128xbf16>, vector<128x128xbf16>, vector<8x128xf32> -> vector<8x128xf32>
    %29 = vector.broadcast %10 : vector<1x128xf32> to vector<8x128xf32>
    %30 = arith.addf %28, %29 : vector<8x128xf32>
    %cst_12 = arith.constant 0.000000e+00 : f32
    %31 = vector.broadcast %cst_12 : f32 to vector<8x128xf32>
    %32 = arith.maximumf %30, %31 : vector<8x128xf32>
    %33 = arith.addf %26, %32 : vector<8x128xf32>
    %34 = arith.truncf %33 : vector<8x128xf32> to vector<8x128xbf16>
    %cst_13 = arith.constant dense<0.000000e+00> : vector<8x128xf32>
    %35 = tpu.matmul %34, %2, %cst_13 {dimension_numbers = #tpu.dot_dimension_numbers<[1], [0], [0], [1], [0, 0, 1, 1], [], []>} : vector<8x128xbf16>, vector<128x128xbf16>, vector<8x128xf32> -> vector<8x128xf32>
    %36 = vector.broadcast %11 : vector<1x128xf32> to vector<8x128xf32>
    %37 = arith.addf %35, %36 : vector<8x128xf32>
    %cst_14 = arith.constant 0.000000e+00 : f32
    %38 = vector.broadcast %cst_14 : f32 to vector<8x128xf32>
    %39 = arith.maximumf %37, %38 : vector<8x128xf32>
    %40 = arith.addf %33, %39 : vector<8x128xf32>
    %41 = arith.truncf %40 : vector<8x128xf32> to vector<8x128xbf16>
    %cst_15 = arith.constant dense<0.000000e+00> : vector<8x128xf32>
    %42 = tpu.matmul %41, %3, %cst_15 {dimension_numbers = #tpu.dot_dimension_numbers<[1], [0], [0], [1], [0, 0, 1, 1], [], []>} : vector<8x128xbf16>, vector<128x128xbf16>, vector<8x128xf32> -> vector<8x128xf32>
    %43 = vector.broadcast %12 : vector<1x128xf32> to vector<8x128xf32>
    %44 = arith.addf %42, %43 : vector<8x128xf32>
    %cst_16 = arith.constant 0.000000e+00 : f32
    %45 = vector.broadcast %cst_16 : f32 to vector<8x128xf32>
    %46 = arith.maximumf %44, %45 : vector<8x128xf32>
    %47 = arith.addf %40, %46 : vector<8x128xf32>
    %48 = arith.truncf %47 : vector<8x128xf32> to vector<8x128xbf16>
    %cst_17 = arith.constant dense<0.000000e+00> : vector<8x128xf32>
    %49 = tpu.matmul %48, %4, %cst_17 {dimension_numbers = #tpu.dot_dimension_numbers<[1], [0], [0], [1], [0, 0, 1, 1], [], []>} : vector<8x128xbf16>, vector<128x128xbf16>, vector<8x128xf32> -> vector<8x128xf32>
    %50 = vector.broadcast %13 : vector<1x128xf32> to vector<8x128xf32>
    %51 = arith.addf %49, %50 : vector<8x128xf32>
    %cst_18 = arith.constant -1.000000e+30 : f32
    %52 = vector.broadcast %cst_18 : f32 to vector<8x128xf32>
    %53 = arith.select %17, %51, %52 : vector<8x128xi1>, vector<8x128xf32>
    %cst_19 = arith.constant dense<0xFF800000> : vector<8xf32>
    %54 = vector.multi_reduction <maximumf>, %53, %cst_19 [1] : vector<8x128xf32> to vector<8xf32>
    %55 = vector.shape_cast %54 : vector<8xf32> to vector<8x1xf32>
    %56 = vector.broadcast %55 : vector<8x1xf32> to vector<8x128xf32>
    %57 = arith.subf %53, %56 : vector<8x128xf32>
    %58 = math.exp %57 : vector<8x128xf32>
    %cst_20 = arith.constant dense<0.000000e+00> : vector<8xf32>
    %59 = vector.multi_reduction <add>, %58, %cst_20 [1] : vector<8x128xf32> to vector<8xf32>
    %60 = vector.shape_cast %59 : vector<8xf32> to vector<8x1xf32>
    %61 = tpu.reciprocal %60 {approx = true} : vector<8x1xf32> -> vector<8x1xf32>
    %62 = vector.broadcast %61 : vector<8x1xf32> to vector<8x128xf32>
    %63 = arith.mulf %58, %62 : vector<8x128xf32>
    %64 = arith.truncf %63 : vector<8x128xf32> to vector<8x128xbf16>
    %cst_21 = arith.constant dense<0.000000e+00> : vector<8x128xf32>
    %65 = tpu.matmul %64, %5, %cst_21 {dimension_numbers = #tpu.dot_dimension_numbers<[1], [0], [0], [1], [0, 0, 1, 1], [], []>} : vector<8x128xbf16>, vector<128x128xbf16>, vector<8x128xf32> -> vector<8x128xf32>
    %66 = arith.truncf %65 : vector<8x128xf32> to vector<8x128xbf16>
    %cst_22 = arith.constant dense<0.000000e+00> : vector<8x128xf32>
    %67 = tpu.matmul %66, %6, %cst_22 {dimension_numbers = #tpu.dot_dimension_numbers<[1], [0], [0], [1], [0, 0, 1, 1], [], []>} : vector<8x128xbf16>, vector<128x128xbf16>, vector<8x128xf32> -> vector<8x128xf32>
    %68 = vector.broadcast %14 : vector<1x128xf32> to vector<8x128xf32>
    %69 = arith.addf %67, %68 : vector<8x128xf32>
    %cst_23 = arith.constant -1.000000e+30 : f32
    %70 = vector.broadcast %cst_23 : f32 to vector<8x128xf32>
    %71 = arith.select %17, %69, %70 : vector<8x128xi1>, vector<8x128xf32>
    %cst_24 = arith.constant dense<0xFF800000> : vector<8xf32>
    %72 = vector.multi_reduction <maximumf>, %71, %cst_24 [1] : vector<8x128xf32> to vector<8xf32>
    %73 = vector.shape_cast %72 : vector<8xf32> to vector<8x1xf32>
    %74 = vector.broadcast %73 : vector<8x1xf32> to vector<8x128xf32>
    %75 = arith.subf %71, %74 : vector<8x128xf32>
    %76 = math.exp %75 : vector<8x128xf32>
    %cst_25 = arith.constant dense<0.000000e+00> : vector<8xf32>
    %77 = vector.multi_reduction <add>, %76, %cst_25 [1] : vector<8x128xf32> to vector<8xf32>
    %78 = vector.shape_cast %77 : vector<8xf32> to vector<8x1xf32>
    %79 = vector.broadcast %78 : vector<8x1xf32> to vector<8x128xf32>
    %80 = arith.divf %76, %79 : vector<8x128xf32>
    %81 = arith.select %19, %44, %80 : vector<8x128xi1>, vector<8x128xf32>
    %c0_26 = arith.constant 0 : index
    %c0_27 = arith.constant 0 : index
    %82 = vector.load %arg3[%c0_26, %c0_27] : memref<8x128xf32, #tpu.memory_space<vmem>>, vector<8x128xf32>
    tpu.vector_store %arg3[%c0_26, %c0_27], %81 {strides = array<i32>} : memref<8x128xf32, #tpu.memory_space<vmem>>, vector<8x128xf32>,
    return
  }
  func.func @transform_0(%arg0: i32) -> (i32, i32) {
    %c0_i32 = arith.constant 0 : i32
    %c0_i32_0 = arith.constant 0 : i32
    return %arg0, %c0_i32 : i32, i32
  }
  func.func @transform_1(%arg0: i32) -> (i32, i32) {
    %c0_i32 = arith.constant 0 : i32
    %c0_i32_0 = arith.constant 0 : i32
    %c0_i32_1 = arith.constant 0 : i32
    return %c0_i32, %c0_i32_0 : i32, i32
  }
  func.func @transform_2(%arg0: i32) -> (i32, i32) {
    %c0_i32 = arith.constant 0 : i32
    %c0_i32_0 = arith.constant 0 : i32
    return %arg0, %c0_i32 : i32, i32
  }
}

</mosaic_0001>

<bundles_post_ra>
// kernel: policy_forward.1
= control target key start
LH: loop header
LB: loop body
LE: loop exit
PB: predicated region body
PF: predicated region fallthrough
CT: control target
= control target key end

     0   :  { %7 = vsyncpa [#allocation3], 0  ;;  %s904_s12 = smov [#allocation2]   ;;  %s905_s14 = smov 64   ;;  %s951_s0 = inlined_call_operand.vmem [shape: f32[8,64], index: 0, kind: input, shape index: {}]   ;;  %s952_s1 = inlined_call_operand.hbm [shape: bf16[848,128], index: 1, kind: input, shape index: {}]   ;;  %s953_s2 = inlined_call_operand.vmem [shape: f32[8,128], index: 2, kind: output, shape index: {}]  }
   0x1   :  { %s14_s11 = sshll.u32 %s952_s1, 4  ;;  %s16_s13 = sshll.u32 %s904_s12, 4  ;;  %s15_s11 = int_to_ptr.hbm [resolvable:$true] %s14_s11  ;;  %s17_s13 = int_to_ptr.vmem [resolvable:$true] %s16_s13 }
   0x2   :  { %s906_s15 = smov 4  }
   0x3   :  { %22 = dma.hbm_to_vmem [thread:$0]  %s15_s11, 6784, %s17_s13, [#allocation3], %s905_s14, %s905_s14, %s906_s15  }
   0x4   :  { %902 = dma.done.wait [#allocation3], 6784  }
   0x5   :  { %903 = vsyncadd [#allocation3], 4294960512  ;;  %v818_v0 = vld [vmem:[#allocation2 + $0x18] sm:$0xff]  ;;  %v817_v2 = vld [vmem:[#allocation2 + $0x10] sm:$0xff]  ;;  %vm165_vm0 = vcmask 523264  }
   0x6   :  { %v826_v1 = vld [vmem:[#allocation2 + $0x58] sm:$0xff]  ;;  %173 = vmatpush.bf16.msra.mxu0 %v818_v0  ;;  %v825_v3 = vld [vmem:[#allocation2 + $0x50] sm:$0xff]  ;;  %v816_v4 = vld [vmem:[#allocation2 + $0x8] sm:$0xff] }
   0x7   :  { %233 = vmatpush.bf16.msra.mxu1 %v826_v1  ;;  %v824_v5 = vld [vmem:[#allocation2 + $0x48] sm:$0xff]  ;;  %v815_v6 = vld [vmem:[#allocation2] sm:$0xff]  ;;  %v822_v10 = vld [vmem:[#allocation2 + $0x38] sm:$0xff] }
   0x8   :  { %v138_v7 = vld [vmem:[%s951_s0] sm:$0xff]  ;;  %v821_v11 = vld [vmem:[#allocation2 + $0x30] sm:$0xff]  ;;  %v820_v12 = vld [vmem:[#allocation2 + $0x28] sm:$0xff] }
   0x9   :  { %v823_v8 = vld [vmem:[#allocation2 + $0x40] sm:$0xff]  ;;  %v139_v9 = vpack.c.bf16 %v138_v7, %v138_v7  ;;  %v834_v14 = vld [vmem:[#allocation2 + $0x98] sm:$0xff]  ;;  %v833_v15 = vld [vmem:[#allocation2 + $0x90] sm:$0xff] }
   0xa   :  { %174 = vmatpush.bf16.msra.mxu0 %v817_v2  ;;  %v819_v13 = vld [vmem:[#allocation2 + $0x20] sm:$0xff]  ;;  %298 = vmatpush.bf16.msra.mxu2 %v834_v14  ;;  %v832_v16 = vld [vmem:[#allocation2 + $0x88] sm:$0xff]  ;;  %v830_v19 = vld [vmem:[#allocation2 + $0x78] sm:$0xff] }
   0xb   :  { %234 = vmatpush.bf16.msra.mxu1 %v825_v3  ;;  %v831_v17 = vld [vmem:[#allocation2 + $0x80] sm:$0xff]  ;;  %v829_v21 = vld [vmem:[#allocation2 + $0x70] sm:$0xff]  ;;  %v828_v28 = vld [vmem:[#allocation2 + $0x68] sm:$0xff]  ;;  %v134_v3 = vlaneseq }
   0xc   :  { %v132_v18 = vld [vmem:[#allocation2 + $0x1a0] sm:$0xf]  ;;  %v842_v30 = vld [vmem:[#allocation2 + $0xd8] sm:$0xff]  ;;  %v841_v31 = vld [vmem:[#allocation2 + $0xd0] sm:$0xff] }
   0xd   :  { %v928_v20 = vunpack.c.l.bf16 %v132_v18  ;;  %v827_v29 = vld [vmem:[#allocation2 + $0x60] sm:$0xff]  ;;  %363 = vmatpush.bf16.msra.mxu3 %v842_v30  ;;  %v840_v32 = vld [vmem:[#allocation2 + $0xc8] sm:$0xff]  ;;  %v838_v34 = vld [vmem:[#allocation2 + $0xb8] sm:$0xff] }
   0xe   :  { %175 = vmatpush.bf16.msra.mxu0 %v816_v4  ;;  %299 = vmatpush.bf16.msra.mxu2 %v833_v15  ;;  %v839_v33 = vld [vmem:[#allocation2 + $0xc0] sm:$0xff]  ;;  %v837_v35 = vld [vmem:[#allocation2 + $0xb0] sm:$0xff]  ;;  %v836_v43 = vld [vmem:[#allocation2 + $0xa8] sm:$0xff]  ;;  %v937_v4 = vand.u32 127, %v134_v3 }
   0xf   :  { %235 = vmatpush.bf16.msra.mxu1 %v824_v5  ;;  %v140_v22 = vperm.slane %v928_v20, 0  ;;  %v184_v36 = vperm.slane %v928_v20, 1  ;;  %v835_v44 = vld [vmem:[#allocation2 + $0xa0] sm:$0xff]  ;;  %v850_v45 = vld [vmem:[#allocation2 + $0x118] sm:$0xff]  ;;  %v849_v46 = vld [vmem:[#allocation2 + $0x110] sm:$0xff]  ;;  %v249_v51 = vperm.slane %v928_v20, 2 }
  0x10   :  { %v848_v47 = vld [vmem:[#allocation2 + $0x108] sm:$0xff]  ;;  %v847_v48 = vld [vmem:[#allocation2 + $0x100] sm:$0xff]  ;;  %v846_v49 = vld [vmem:[#allocation2 + $0xf8] sm:$0xff]  ;;  %v314_v60 = vperm.slane %v928_v20, 3  ;;  %v379_v5 = vperm.slane %v928_v20, 4  ;;  %vm136_vm1 = vcmp.lt.s32.totalorder %v937_v4, 8 }
  0x11   :  { %364 = vmatpush.bf16.msra.mxu3 %v841_v31  ;;  %v845_v50 = vld [vmem:[#allocation2 + $0xf0] sm:$0xff]  ;;  %v844_v58 = vld [vmem:[#allocation2 + $0xe8] sm:$0xff]  ;;  %v843_v59 = vld [vmem:[#allocation2 + $0xe0] sm:$0xff]  ;;  %vm137_vm6 = vcmp.eq.s32.totalorder %v937_v4, 32 }
  0x12   :  { %176 = vmatpush.bf16.msra.mxu0 %v815_v6  ;;  %300 = vmatpush.bf16.msra.mxu2 %v832_v16  ;;  %v854_v14 = vld [vmem:[#allocation2 + $0x138] sm:$0xff]  ;;  %v860_v30 = vld [vmem:[#allocation2 + $0x168] sm:$0xff] }
  0x13   :  { %236 = vmatpush.bf16.msra.mxu1 %v823_v8 }
  0x15   :  { %622 = vmatmul.msk.bf16.vlgmr.msra.gmra.mxu0 %vm165_vm0, %v139_v9  ;;  %365 = vmatpush.bf16.msra.mxu3 %v840_v32 }
  0x16   :  { %301 = vmatpush.bf16.msra.mxu2 %v831_v17  ;;  %428 = vmatpush.bf16.msrb.mxu0 %v850_v45 }
  0x17   :  { %237 = vmatpush.bf16.msra.mxu1 %v822_v10  ;;  %v858_v10 = vld [vmem:[#allocation2 + $0x158] sm:$0xff] }
  0x19   :  { %366 = vmatpush.bf16.msra.mxu3 %v839_v33 }
  0x1a   :  { %302 = vmatpush.bf16.msra.mxu2 %v830_v19  ;;  %429 = vmatpush.bf16.msrb.mxu0 %v849_v46  ;;  %v853_v19 = vld [vmem:[#allocation2 + $0x130] sm:$0xff] }
  0x1b   :  { %238 = vmatpush.bf16.msra.mxu1 %v821_v11  ;;  %v857_v11 = vld [vmem:[#allocation2 + $0x150] sm:$0xff] }
  0x1d   :  { %367 = vmatpush.bf16.msra.mxu3 %v838_v34  ;;  %v859_v34 = vld [vmem:[#allocation2 + $0x160] sm:$0xff] }
  0x1e   :  { %303 = vmatpush.bf16.msra.mxu2 %v829_v21  ;;  %430 = vmatpush.bf16.msrb.mxu0 %v848_v47  ;;  %v852_v21 = vld [vmem:[#allocation2 + $0x128] sm:$0xff] }
  0x1f   :  { %239 = vmatpush.bf16.msra.mxu1 %v820_v12  ;;  %v856_v12 = vld [vmem:[#allocation2 + $0x148] sm:$0xff] }
  0x21   :  { %368 = vmatpush.bf16.msra.mxu3 %v837_v35 }
  0x22   :  { %304 = vmatpush.bf16.msra.mxu2 %v828_v28  ;;  %431 = vmatpush.bf16.msrb.mxu0 %v847_v48  ;;  %v861_v28 = vld [vmem:[#allocation2 + $0x170] sm:$0xff] }
  0x23   :  { %240 = vmatpush.bf16.msra.mxu1 %v819_v13  ;;  %v855_v13 = vld [vmem:[#allocation2 + $0x140] sm:$0xff] }
  0x25   :  { %369 = vmatpush.bf16.msra.mxu3 %v836_v43 }
  0x26   :  { %305 = vmatpush.bf16.msra.mxu2 %v827_v29  ;;  %432 = vmatpush.bf16.msrb.mxu0 %v846_v49 }
  0x27   :  { %500 = vmatpush.bf16.msrb.mxu1 %v858_v10 }
  0x29   :  { %370 = vmatpush.bf16.msra.mxu3 %v835_v44 }
  0x2a   :  { %433 = vmatpush.bf16.msrb.mxu0 %v845_v50 }
  0x2b   :  { %501 = vmatpush.bf16.msrb.mxu1 %v857_v11 }
  0x2e   :  { %434 = vmatpush.bf16.msrb.mxu0 %v844_v58 }
  0x2f   :  { %502 = vmatpush.bf16.msrb.mxu1 %v856_v12 }
  0x32   :  { %435 = vmatpush.bf16.msrb.mxu0 %v843_v59 }
  0x33   :  { %503 = vmatpush.bf16.msrb.mxu1 %v855_v13 }
  0x37   :  { %504 = vmatpush.bf16.msrb.mxu1 %v854_v14 }
  0x3b   :  { %505 = vmatpush.bf16.msrb.mxu1 %v853_v19 }
  0x3f   :  { %506 = vmatpush.bf16.msrb.mxu1 %v852_v21 }
  0x92   :  { %v178_v23 = vpop.f32.mrf.mxu0 }
  0x93   :  { %v179_v24 = vadd.f32 %v178_v23, %v140_v22  ;;  %v851_v22 = vld [vmem:[#allocation2 + $0x120] sm:$0xff]  ;;  %v866_v23 = vld [vmem:[#allocation2 + $0x198] sm:$0xff] }
  0x94   :  { %507 = vmatpush.bf16.msrb.mxu1 %v851_v22  ;;  %563 = vmatpush.bf16.msrb.mxu2 %v866_v23 }
  0x95   :  { %v182_v25 = vmax.f32 %v179_v24, 0.0  ;;  %v865_v24 = vld [vmem:[#allocation2 + $0x190] sm:$0xff] }
  0x97   :  { %v183_v26 = vpack.c.bf16 %v182_v25, %v182_v25 }
  0x98   :  { %564 = vmatpush.bf16.msrb.mxu2 %v865_v24 }
  0x99   :  { %241 = vmatmul.bf16.vlgmr.msra.gmra.mxu1 %v183_v26  ;;  %v863_v26 = vld [vmem:[#allocation2 + $0x180] sm:$0xff] }
  0x9a   :  { %v180_v27 = vpop.f32.mrf.mxu0 }
  0x9b   :  { %v862_v27 = vld [vmem:[#allocation2 + $0x178] sm:$0xff] }
 0x116   :  { %v242_v37 = vpop.f32.mrf.mxu1 }
 0x117   :  { %v243_v38 = vadd.f32 %v242_v37, %v184_v36 }
 0x119   :  { %v246_v39 = vmax.f32 %v243_v38, 0.0  ;;  %v514_v38 = vperm.slane %v928_v20, 5 }
 0x11b   :  { %v247_v40 = vadd.f32 %v246_v39, %v182_v25  ;;  %v864_v25 = vld [vmem:[#allocation2 + $0x188] sm:$0xff] }
 0x11c   :  { %565 = vmatpush.bf16.msrb.mxu2 %v864_v25 }
 0x11d   :  { %v248_v41 = vpack.c.bf16 %v247_v40, %v247_v40 }
 0x11e   :  { %v244_v42 = vpop.f32.mrf.mxu1 }
 0x11f   :  { %306 = vmatmul.bf16.vlgmr.msra.gmra.mxu2 %v248_v41 }
 0x120   :  { %566 = vmatpush.bf16.msrb.mxu2 %v863_v26 }
 0x124   :  { %567 = vmatpush.bf16.msrb.mxu2 %v862_v27 }
 0x128   :  { %568 = vmatpush.bf16.msrb.mxu2 %v861_v28 }
 0x12c   :  { %569 = vmatpush.bf16.msrb.mxu2 %v860_v30 }
 0x130   :  { %570 = vmatpush.bf16.msrb.mxu2 %v859_v34 }
 0x1a2   :  { %v307_v52 = vpop.f32.mrf.mxu2 }
 0x1a3   :  { %v308_v53 = vadd.f32 %v307_v52, %v249_v51 }
 0x1a5   :  { %v311_v54 = vmax.f32 %v308_v53, 0.0 }
 0x1a7   :  { %v312_v55 = vadd.f32 %v311_v54, %v247_v40 }
 0x1a9   :  { %v313_v56 = vpack.c.bf16 %v312_v55, %v312_v55 }
 0x1aa   :  { %v309_v57 = vpop.f32.mrf.mxu2 }
 0x1ab   :  { %371 = vmatmul.bf16.vlgmr.msra.gmra.mxu3 %v313_v56 }
 0x22e   :  { %v372_v61 = vpop.f32.mrf.mxu3 }
 0x22f   :  { %v934_v62 = vadd.f32 %v372_v61, %v314_v60 }
 0x231   :  { %v376_v63 = vmax.f32 %v934_v62, 0.0 }
 0x233   :  { %v377_v0 = vadd.f32 %v376_v63, %v312_v55 }
 0x235   :  { %v378_v1 = vpack.c.bf16 %v377_v0, %v377_v0 }
 0x236   :  { %v374_v2 = vpop.f32.mrf.mxu3 }
 0x237   :  { %436 = vmatmul.bf16.vlgmr.msrb.gmra.mxu0 %v378_v1 }
 0x2b4   :  { %v437_v6 = vpop.f32.mrf.mxu0 }
 0x2b5   :  { %v438_v7 = vadd.f32 %v437_v6, %v379_v5 }
 0x2b7   :  { %v441_v8 = vsel %vm136_vm1, %v438_v7, -1e+30 }
 0x2b8   :  { %442 = vmax.xlane.f32.xlu0 %v441_v8 }
 0x2bc   :  { %v439_v9 = vpop.f32.mrf.mxu0 }
 0x32b   :  { %v443_v15 = vpop.xlane.xlu0 %442 }
 0x32c   :  { %v444_v16 = vsub.f32 %v441_v8, %v443_v15 }
 0x32e   :  { %v445_v17 = vmul.f32 1.442695, %v444_v16 }
 0x330   :  { %870 = vpow2.f32 %v445_v17 }
 0x336   :  { %v871_v18 = vpop.eup %870 }
 0x337   :  { %447 = vadd.xlane.f32.xlu0 %v871_v18 }
 0x3aa   :  { %v448_v29 = vpop.xlane.xlu0 %447 }
 0x3ab   :  { %872 = vrcp.f32 %v448_v29 }
 0x3b1   :  { %v873_v31 = vpop.eup %872 }
 0x3b2   :  { %v450_v32 = vmul.f32 %v873_v31, %v871_v18 }
 0x3b4   :  { %v451_v33 = vpack.c.bf16 %v450_v32, %v450_v32 }
 0x3b6   :  { %508 = vmatmul.bf16.vlgmr.msrb.gmra.mxu1 %v451_v33 }
 0x433   :  { %v509_v35 = vpop.f32.mrf.mxu1 }
 0x434   :  { %v513_v36 = vpack.c.bf16 %v509_v35, %v509_v35 }
 0x436   :  { %571 = vmatmul.bf16.vlgmr.msrb.gmra.mxu2 %v513_v36 }
 0x43b   :  { %v511_v37 = vpop.f32.mrf.mxu1 }
 0x4b9   :  { %v572_v39 = vpop.f32.mrf.mxu2 }
 0x4ba   :  { %v573_v40 = vadd.f32 %v572_v39, %v514_v38 }
 0x4bc   :  { %v576_v41 = vsel %vm136_vm1, %v573_v40, -1e+30 }
 0x4bd   :  { %577 = vmax.xlane.f32.xlu1 %v576_v41 }
 0x4c1   :  { %v574_v42 = vpop.f32.mrf.mxu2 }
 0x530   :  { %v578_v43 = vpop.xlane.xlu1 %577 }
 0x531   :  { %v579_v44 = vsub.f32 %v576_v41, %v578_v43 }
 0x533   :  { %v580_v45 = vmul.f32 1.442695, %v579_v44 }
 0x535   :  { %874 = vpow2.f32 %v580_v45 }
 0x53b   :  { %v875_v46 = vpop.eup %874 }
 0x53c   :  { %582 = vadd.xlane.f32.xlu1 %v875_v46 }
 0x5af   :  { %v583_v47 = vpop.xlane.xlu1 %582 }
 0x5b0   :  { %876 = vrcp.f32 %v583_v47  ;;  %v595_v51 = vand.u32 2147483648, %v583_v47  ;;  %v593_v52 = vand.u32 2147483647, %v583_v47  ;;  %vm589_vm3 = vweird.f32 %v583_v47 }
 0x5b2   :  { %v596_v54 = vor.u32 1.1754944e-38, %v595_v51  ;;  %vm594_vm5 = vcmp.eq.f32.partialorder %v593_v52, 8.507059e+37 }
 0x5b6   :  { %v877_v48 = vpop.eup %876 }
 0x5b7   :  { %v585_v49 = vmul.f32 %v877_v48, %v583_v47  ;;  %vm590_vm2 = vweird.f32 %v877_v48 }
 0x5b8   :  { %vm591_vm4 = vmor %vm589_vm3, %vm590_vm2 }
 0x5b9   :  { %v586_v50 = vsub.f32 1.0, %v585_v49 }
 0x5bb   :  { %v587_v20 = vmul.f32 %v877_v48, %v586_v50 }
 0x5bd   :  { %v588_v53 = vadd.f32 %v877_v48, %v587_v20 }
 0x5bf   :  { %v592_v55 = vsel %vm591_vm4, %v877_v48, %v588_v53 }
 0x5c0   :  { %v597_v56 = vsel %vm594_vm5, %v596_v54, %v592_v55 }
 0x5c1   :  { %v598_v57 = vmul.f32 %v875_v46, %v597_v56 }
 0x5c3   :  { %v599_v58 = vsel %vm137_vm6, %v934_v62, %v598_v57 }
 0x5c4   :  { %600 = vst [vmem:[%s953_s2] sm:$0xff] %v599_v58 }
 0x5c5   :  { %605 = vsyncpa [#allocation3], 1 }

</bundles_post_ra>
